<compile_context>
chip_gen: v5e
topology: v5e:2x2
jax: 0.10.0
libtpu: 0.0.40
codegen_flags: <defaults>
</compile_context>

<pallas_src>
import jax
import jax.numpy as jnp
from jax.experimental import pallas as pl
from jax.experimental.pallas import tpu as pltpu

_LANES = 128
_TARGET_BLOCK_BYTES = 4 << 20   # ~4 MiB/block -> ~16 MiB VMEM with in+out double buffering
_VMEM_LIMIT_BYTES = 32 << 20    # raises v5e's 16 MiB scoped default; == default on v6e/v7x
_SPLIT_BYTES = 1 << 20          # arrays above this always get >=2 grid steps (v7x megacore)


def _rish_kernel(alpha_ref, beta_ref, x_ref, o_ref):
    # (1,1) scalars live in SMEM -> scalar-register reads, no vreg broadcast.
    a = alpha_ref[0, 0]
    b = beta_ref[0, 0]
    # Compute in f32 (safe on v5e, which lacks bf16 VPU/EUP; no-op for f32 input).
    x = x_ref[...].astype(jnp.float32)
    # Exact division: HBM-bound kernel, exactness is free and matches torch.
    # For very negative x, exp(-x) -> inf and y -> -0, which is well-defined.
    y = b * x / (jnp.exp(-x) + a)
    o_ref[...] = y.astype(o_ref.dtype)


def _rish_2d(x2d, alpha, beta):
    """Run the Pallas kernel on a lane-dense (rows, 128) slab."""
    rows, lanes = x2d.shape
    itemsize = jnp.dtype(x2d.dtype).itemsize
    total_bytes = rows * lanes * itemsize
    n = rows * lanes

    # Sublane multiple per dtype: f32 -> 8, bf16 -> 16, int8/fp8 -> 32.
    sub = max(8, 32 // itemsize)

    # Constant-byte block budget so reduced-precision dtypes keep the same
    # bytes moved per grid step (stays on the HBM roofline for all dtypes).
    budget_rows = max(sub, _TARGET_BLOCK_BYTES // (lanes * itemsize))
    budget_rows = (budget_rows // sub) * sub

    if rows <= budget_rows:
        if total_bytes > _SPLIT_BYTES and rows >= 2 * sub:
            # Guarantee >=2 grid steps so both v7x TensorCores share the HBM
            # bandwidth (irrelevant but harmless on single-TC v5e/v6e).
            blk_rows = ((pl.cdiv(rows, 2) + sub - 1) // sub) * sub
        else:
            blk_rows = rows  # tiny input: one block, zero pipeline overhead
    else:
        blk_rows = budget_rows

    grid = (pl.cdiv(rows, blk_rows),)

    return pl.pallas_call(
        _rish_kernel,
        out_shape=jax.ShapeDtypeStruct((rows, lanes), x2d.dtype),
        grid_spec=pltpu.PrefetchScalarGridSpec(
            num_scalar_prefetch=0,
            grid=grid,
            in_specs=[
                pl.BlockSpec(memory_space=pltpu.SMEM),               # alpha (1,1)
                pl.BlockSpec(memory_space=pltpu.SMEM),               # beta  (1,1)
                pl.BlockSpec((blk_rows, lanes), lambda i: (i, 0)),   # x tile
            ],
            out_specs=pl.BlockSpec((blk_rows, lanes), lambda i: (i, 0)),
        ),
        compiler_params=pltpu.CompilerParams(
            dimension_semantics=("parallel",),   # megacore-shards rows on v7x
            vmem_limit_bytes=_VMEM_LIMIT_BYTES,
        ),
        cost_estimate=pl.CostEstimate(
            flops=3 * n, transcendentals=n, bytes_accessed=2 * total_bytes),
    )(alpha, beta, x2d)


def rish(x, alpha, beta):
    """Elementwise Rish: beta * x / (exp(-x) + alpha). Works on any input shape."""
    orig_shape = x.shape
    n = x.size
    if n == 0:
        return x
    flat = x.reshape(-1)

    # Lane-dense split: 128-aligned bulk -> Pallas kernel; <128-element ragged
    # tail -> plain XLA (avoids the whole-array pad + slice HBM round trip).
    n_bulk = (n // _LANES) * _LANES
    n_tail = n - n_bulk

    parts = []
    if n_bulk:
        rows = n_bulk // _LANES
        bulk = flat[:n_bulk].reshape(rows, _LANES)   # free reshape when n_tail == 0
        parts.append(_rish_2d(bulk, alpha, beta).reshape(-1))
    if n_tail:
        t = flat[n_bulk:].astype(jnp.float32)
        a = alpha.reshape(()).astype(jnp.float32)
        b = beta.reshape(()).astype(jnp.float32)
        parts.append((b * t / (jnp.exp(-t) + a)).astype(x.dtype))

    out = parts[0] if len(parts) == 1 else jnp.concatenate(parts)
    return out.reshape(orig_shape)


def rish_reference(x, alpha, beta):
    # Pure-JAX reference matching the PyTorch forward exactly.
    return beta * x / (jnp.exp(-x) + alpha)


if __name__ == "__main__":
    key = jax.random.PRNGKey(0)
    x = jax.random.normal(key, (2, 4, 16, 16), dtype=jnp.float32)  # NCHW

    # Deterministic parameter init, matching nn.Parameter(torch.ones((1, 1))).
    alpha = jnp.ones((1, 1), dtype=jnp.float32)
    beta = jnp.ones((1, 1), dtype=jnp.float32)

    y = jax.block_until_ready(rish(x, alpha, beta))
    y_ref = rish_reference(x, alpha, beta)

    assert y.shape == x.shape and y.dtype == x.dtype
    # Exact division in-kernel -> tight tolerance (only exp implementation ULPs differ).
    assert jnp.allclose(y, y_ref, atol=1e-5, rtol=1e-5), float(
        jnp.max(jnp.abs(y - y_ref)))

    print("KERNEL_OK")
</pallas_src>

<mosaic_0001>
module attributes {stable_mosaic.version = 11 : i64} {
  func.func @_rish_kernel(%arg0: i32, %arg1: memref<1x1xf32, #tpu.memory_space<smem>>, %arg2: memref<1x1xf32, #tpu.memory_space<smem>>, %arg3: memref<16x128xf32, #tpu.memory_space<vmem>>, %arg4: memref<16x128xf32, #tpu.memory_space<vmem>>) attributes {dimension_semantics = [#tpu.dimension_semantics<parallel>], iteration_bounds = array<i64: 1>, scalar_prefetch = 0 : i64, scratch_operands = 0 : i64, tpu.core_type = #tpu.core_type<tc>, window_params = [{transform_indices = @transform_0, window_bounds = array<i64: 1, 1>}, {transform_indices = @transform_1, window_bounds = array<i64: 1, 1>}, {transform_indices = @transform_2, window_bounds = array<i64: 16, 128>}, {transform_indices = @transform_3, window_bounds = array<i64: 16, 128>}]} {
    %c0 = arith.constant 0 : index
    %c0_0 = arith.constant 0 : index
    %0 = memref.load %arg1[%c0, %c0_0] : memref<1x1xf32, #tpu.memory_space<smem>>
    %c0_1 = arith.constant 0 : index
    %c0_2 = arith.constant 0 : index
    %1 = memref.load %arg2[%c0_1, %c0_2] : memref<1x1xf32, #tpu.memory_space<smem>>
    %c0_3 = arith.constant 0 : index
    %c0_4 = arith.constant 0 : index
    %2 = vector.load %arg3[%c0_3, %c0_4] : memref<16x128xf32, #tpu.memory_space<vmem>>, vector<16x128xf32>
    %3 = vector.broadcast %1 : f32 to vector<16x128xf32>
    %4 = arith.mulf %3, %2 : vector<16x128xf32>
    %cst = arith.constant 0.000000e+00 : f32
    %5 = vector.broadcast %cst : f32 to vector<16x128xf32>
    %6 = arith.subf %5, %2 : vector<16x128xf32>
    %7 = math.exp %6 : vector<16x128xf32>
    %8 = vector.broadcast %0 : f32 to vector<16x128xf32>
    %9 = arith.addf %7, %8 : vector<16x128xf32>
    %10 = arith.divf %4, %9 : vector<16x128xf32>
    %c0_5 = arith.constant 0 : index
    %c0_6 = arith.constant 0 : index
    %11 = vector.load %arg4[%c0_5, %c0_6] : memref<16x128xf32, #tpu.memory_space<vmem>>, vector<16x128xf32>
    tpu.vector_store %arg4[%c0_5, %c0_6], %10 {strides = array<i32>} : memref<16x128xf32, #tpu.memory_space<vmem>>, vector<16x128xf32>,
    return
  }
  func.func @transform_0(%arg0: i32) -> (i32, i32) {
    %c0_i32 = arith.constant 0 : i32
    %c0_i32_0 = arith.constant 0 : i32
    %c0_i32_1 = arith.constant 0 : i32
    return %c0_i32, %c0_i32_0 : i32, i32
  }
  func.func @transform_1(%arg0: i32) -> (i32, i32) {
    %c0_i32 = arith.constant 0 : i32
    %c0_i32_0 = arith.constant 0 : i32
    %c0_i32_1 = arith.constant 0 : i32
    return %c0_i32, %c0_i32_0 : i32, i32
  }
  func.func @transform_2(%arg0: i32) -> (i32, i32) {
    %c0_i32 = arith.constant 0 : i32
    %c0_i32_0 = arith.constant 0 : i32
    return %arg0, %c0_i32 : i32, i32
  }
  func.func @transform_3(%arg0: i32) -> (i32, i32) {
    %c0_i32 = arith.constant 0 : i32
    %c0_i32_0 = arith.constant 0 : i32
    return %arg0, %c0_i32 : i32, i32
  }
}

</mosaic_0001>

<bundles_post_ra>
// kernel: tpu_custom_call.1
= control target key start
LH: loop header
LB: loop body
LE: loop exit
PB: predicated region body
PF: predicated region fallthrough
CT: control target
= control target key end

     0   :  { %10 = vsyncpa [#allocation5], 0  ;;  %s212_s0 = inlined_call_operand.<no memory space> [shape: f32[1,1], index: 0, kind: input, shape index: {}]   ;;  %s213_s1 = inlined_call_operand.<no memory space> [shape: f32[1,1], index: 1, kind: input, shape index: {}]   ;;  %s214_s2 = inlined_call_operand.hbm [shape: f32[16,128], index: 2, kind: input, shape index: {}]   ;;  %s215_s3 = inlined_call_operand.hbm [shape: f32[16,128], index: 3, kind: output, shape index: {}]  }
   0x1   :  { %11 = vsyncpa [#allocation6], 0  ;;  %s20_s14 = sshll.u32 %s214_s2, 4  ;;  %s164_s15 = smov [#allocation4]   ;;  %s21_s14 = int_to_ptr.hbm [resolvable:$true] %s20_s14 }
   0x2   :  { %s22_s16 = sshll.u32 %s164_s15, 4  ;;  %s165_s17 = smov 128   ;;  %s23_s16 = int_to_ptr.vmem [resolvable:$true] %s22_s16 }
   0x3   :  { %s166_s18 = smov 8  }
   0x4   :  { %28 = dma.hbm_to_vmem [thread:$0]  %s21_s14, 256, %s23_s16, [#allocation5], %s165_s17, %s165_s17, %s166_s18  }
   0x5   :  { %160 = dma.done.wait [#allocation5], 256  }
   0x6   :  { %161 = vsyncadd [#allocation5], 4294967040  ;;  %v35_v0 = vld [vmem:[#allocation4] sm:$0xff]  ;;  %v36_v1 = vld [vmem:[#allocation4 + $0x8] sm:$0xff]  ;;  %v46_v6 = vstv %s212_s0  ;;  %v37_v14 = vstv %s213_s1  ;;  %s167_s0 = smov [#allocation7]   ;;  %s87_s24 = sshll.u32 %s215_s3, 4  ;;  %s88_s24 = int_to_ptr.hbm [resolvable:$true] %s87_s24 }
   0x7   :  { %v40_v2 = vsub.f32 0.0, %v35_v0  ;;  %v41_v3 = vsub.f32 0.0, %v36_v1  ;;  %v38_v26 = vmul.f32 %v37_v14, %v35_v0  ;;  %v39_v29 = vmul.f32 %v37_v14, %v36_v1  ;;  %s85_s1 = sshll.u32 %s167_s0, 4  ;;  %s86_s1 = int_to_ptr.vmem [resolvable:$true] %s85_s1 }
   0x9   :  { %v42_v4 = vmul.f32 1.442695, %v40_v2  ;;  %v44_v5 = vmul.f32 1.442695, %v41_v3 }
   0xb   :  { %104 = vpow2.f32 %v42_v4 }
   0xc   :  { %106 = vpow2.f32 %v44_v5 }
  0x11   :  { %v105_v7 = vpop.eup %104 }
  0x12   :  { %v107_v8 = vpop.eup %106  ;;  %v47_v9 = vadd.f32 %v105_v7, %v46_v6 }
  0x13   :  { %v48_v10 = vadd.f32 %v107_v8, %v46_v6 }
  0x14   :  { %108 = vrcp.f32 %v47_v9  ;;  %vm54_vm0 = vweird.f32 %v47_v9  ;;  %v60_v15 = vand.u32 2147483648, %v47_v9  ;;  %v58_v18 = vand.u32 2147483647, %v47_v9 }
  0x15   :  { %110 = vrcp.f32 %v48_v10  ;;  %v75_v19 = vand.u32 2147483648, %v48_v10  ;;  %vm69_vm2 = vweird.f32 %v48_v10  ;;  %v73_v21 = vand.u32 2147483647, %v48_v10 }
  0x16   :  { %v61_v24 = vor.u32 1.1754944e-38, %v60_v15  ;;  %vm59_vm5 = vcmp.eq.f32.partialorder %v58_v18, 8.507059e+37 }
  0x17   :  { %v76_v28 = vor.u32 1.1754944e-38, %v75_v19  ;;  %vm74_vm7 = vcmp.eq.f32.partialorder %v73_v21, 8.507059e+37 }
  0x1a   :  { %v109_v11 = vpop.eup %108 }
  0x1b   :  { %v111_v12 = vpop.eup %110  ;;  %v50_v13 = vmul.f32 %v109_v11, %v47_v9  ;;  %vm55_vm1 = vweird.f32 %v109_v11 }
  0x1c   :  { %v65_v16 = vmul.f32 %v111_v12, %v48_v10  ;;  %vm70_vm3 = vweird.f32 %v111_v12  ;;  %vm200_vm4 = vmor %vm54_vm0, %vm55_vm1 }
  0x1d   :  { %v51_v17 = vsub.f32 1.0, %v50_v13  ;;  %vm71_vm6 = vmor %vm69_vm2, %vm70_vm3 }
  0x1e   :  { %v66_v20 = vsub.f32 1.0, %v65_v16 }
  0x1f   :  { %v52_v22 = vmul.f32 %v109_v11, %v51_v17 }
  0x20   :  { %v67_v25 = vmul.f32 %v111_v12, %v66_v20 }
  0x21   :  { %v53_v27 = vadd.f32 %v109_v11, %v52_v22 }
  0x22   :  { %v68_v30 = vadd.f32 %v111_v12, %v67_v25 }
  0x23   :  { %v57_v31 = vsel %vm200_vm4, %v109_v11, %v53_v27 }
  0x24   :  { %v62_v32 = vsel %vm59_vm5, %v61_v24, %v57_v31  ;;  %v72_v33 = vsel %vm71_vm6, %v111_v12, %v68_v30 }
  0x25   :  { %v63_v34 = vmul.f32 %v62_v32, %v38_v26  ;;  %v77_v35 = vsel %vm74_vm7, %v76_v28, %v72_v33 }
  0x26   :  { %v78_v36 = vmul.f32 %v77_v35, %v39_v29 }
  0x27   :  { %79 = vst [vmem:[#allocation7] sm:$0xff] %v63_v34 }
  0x28   :  { %80 = vst [vmem:[#allocation7 + $0x8] sm:$0xff] %v78_v36 }
  0x29   :  { %93 = dma.vmem_to_hbm [thread:$0]  %s86_s1, 256, %s88_s24, [#allocation6], %s165_s17, %s165_s17, %s166_s18  }
  0x2a   :  { %162 = dma.done.wait [#allocation6], 256  }
  0x2b   :  { %163 = vsyncadd [#allocation6], 4294967040 }
  0x2c   :  { %98 = vsyncpa [#allocation5], 1 }
  0x2d   :  { %99 = vsyncpa [#allocation6], 1 }

</bundles_post_ra>
